<compile_context>
chip_gen: v5e
topology: v5e:2x2
jax: 0.10.0
libtpu: 0.0.40
codegen_flags: <defaults>
</compile_context>

<pallas_src>
import functools

import jax
import jax.numpy as jnp
from jax.experimental import pallas as pl
from jax.experimental.pallas import tpu as pltpu


def _round_up(x, m):
    return ((x + m - 1) // m) * m


def _self_output_kernel(x_ref, w_ref, b_ref, res_ref, gamma_ref, beta_ref,
                        o_ref, *, eps):
    # x_ref:     (tm, H)  hidden_states tile (bf16 fast path)
    # w_ref:     (H, H)   dense weight (in x out), full, grid-invariant
    # b_ref:     (1, H)   dense bias
    # res_ref:   (tm, H)  residual (input_tensor) tile
    # gamma_ref: (1, H)   LayerNorm weight
    # beta_ref:  (1, H)   LayerNorm bias

    # Dense: x @ W  on the MXU; operands in their stored (bf16) dtype, f32 acc.
    y = jnp.dot(x_ref[...], w_ref[...], preferred_element_type=jnp.float32)

    # Load each small ref exactly once; all elementwise math in f32 (VPU).
    bias = b_ref[...].astype(jnp.float32)
    res = res_ref[...].astype(jnp.float32)
    gamma = gamma_ref[...].astype(jnp.float32)
    beta = beta_ref[...].astype(jnp.float32)

    # Dropout is identity in eval mode.
    # TODO(synk): training-mode dropout (hidden_dropout_prob) not implemented.
    y = y + bias + res

    # LayerNorm over last axis (hidden), f32 statistics.
    mean = jnp.mean(y, axis=-1, keepdims=True)
    centered = y - mean
    var = jnp.mean(centered * centered, axis=-1, keepdims=True)
    inv = jax.lax.rsqrt(var + eps)
    out = centered * inv * gamma + beta

    o_ref[...] = out.astype(o_ref.dtype)


def layoutlmv2_self_output(hidden_states, input_tensor, w, b, gamma, beta,
                           *, eps=1e-12, tile_m=256, use_bf16_matmul=True):
    """hidden_states, input_tensor: [B, S, H]; w: [H, H] (in x out); b/gamma/beta: [H]."""
    B, S, H = hidden_states.shape
    M = B * S
    out_dtype = hidden_states.dtype

    x2 = hidden_states.reshape(M, H)
    r2 = input_tensor.reshape(M, H)

    # Effective row tile: multiple of 8 (sublane), no larger than the padded
    # row count.  Rows are zero-padded to a multiple of tile_m and sliced off
    # after the kernel.
    tile_m = max(8, min(_round_up(tile_m, 8), _round_up(M, 8)))
    m_pad = _round_up(M, tile_m)
    if m_pad != M:
        pad = m_pad - M
        x2 = jnp.pad(x2, ((0, pad), (0, 0)))
        r2 = jnp.pad(r2, ((0, pad), (0, 0)))

    # bf16 matmul operands (single cast in the wrapper), f32 accumulation in
    # the kernel.  Residual / bias / LayerNorm params stay in f32.
    if use_bf16_matmul:
        x2 = x2.astype(jnp.bfloat16)
        w = w.astype(jnp.bfloat16)

    b2 = b.reshape(1, H).astype(jnp.float32)
    g2 = gamma.reshape(1, H).astype(jnp.float32)
    be2 = beta.reshape(1, H).astype(jnp.float32)

    grid = (m_pad // tile_m,)

    cost = pl.CostEstimate(
        flops=2 * m_pad * H * H,
        transcendentals=m_pad,  # one rsqrt per row
        bytes_accessed=int(
            x2.size * x2.dtype.itemsize
            + w.size * w.dtype.itemsize
            + r2.size * r2.dtype.itemsize
            + (b2.size + g2.size + be2.size) * 4
            + m_pad * H * jnp.dtype(out_dtype).itemsize
        ),
    )

    def build_call(weight_pipeline_mode):
        if weight_pipeline_mode is None:
            w_spec = pl.BlockSpec((H, H), lambda i: (0, 0))
        else:
            # Weight index_map is constant -> keep it resident with one buffer.
            w_spec = pl.BlockSpec((H, H), lambda i: (0, 0),
                                  pipeline_mode=weight_pipeline_mode)
        return pl.pallas_call(
            functools.partial(_self_output_kernel, eps=eps),
            out_shape=jax.ShapeDtypeStruct((m_pad, H), out_dtype),
            grid_spec=pltpu.PrefetchScalarGridSpec(
                num_scalar_prefetch=0,
                grid=grid,
                in_specs=[
                    pl.BlockSpec((tile_m, H), lambda i: (i, 0)),   # hidden_states tile
                    w_spec,                                        # weight (full, resident)
                    pl.BlockSpec((1, H), lambda i: (0, 0)),        # bias
                    pl.BlockSpec((tile_m, H), lambda i: (i, 0)),   # residual tile
                    pl.BlockSpec((1, H), lambda i: (0, 0)),        # ln gamma
                    pl.BlockSpec((1, H), lambda i: (0, 0)),        # ln beta
                ],
                out_specs=pl.BlockSpec((tile_m, H), lambda i: (i, 0)),
            ),
            compiler_params=pltpu.CompilerParams(
                dimension_semantics=("parallel",),
                vmem_limit_bytes=32 * 1024 * 1024,
            ),
            cost_estimate=cost,
        )

    try:
        out = build_call(pl.Buffered(buffer_count=1))(x2, w, b2, r2, g2, be2)
    except Exception:
        # Fall back to default (double-buffered) weight if single-buffering is
        # unsupported on this jax/Mosaic version.
        out = build_call(None)(x2, w, b2, r2, g2, be2)

    return out[:M].reshape(B, S, H)


def _reference(hidden_states, input_tensor, w, b, gamma, beta, eps=1e-12,
               use_bf16_matmul=True):
    if use_bf16_matmul:
        x = hidden_states.astype(jnp.bfloat16)
        wm = w.astype(jnp.bfloat16)
    else:
        x = hidden_states.astype(jnp.float32)
        wm = w.astype(jnp.float32)
    y = jnp.einsum("bsh,ho->bso", x, wm,
                   preferred_element_type=jnp.float32) + b
    y = y + input_tensor.astype(jnp.float32)
    mean = jnp.mean(y, axis=-1, keepdims=True)
    var = jnp.mean((y - mean) ** 2, axis=-1, keepdims=True)
    return ((y - mean) * jax.lax.rsqrt(var + eps)) * gamma + beta


if __name__ == "__main__":
    key = jax.random.PRNGKey(0)
    B, S, H = 2, 8, 32  # batch=2, seq=8, hidden=32
    eps = 1e-12

    k1, k2, k3, k4, k5 = jax.random.split(key, 5)
    hidden_states = jax.random.normal(k1, (B, S, H), dtype=jnp.float32)
    input_tensor = jax.random.normal(k2, (B, S, H), dtype=jnp.float32)

    # Deterministic parameter init (synthetic, not a checkpoint).
    # w is stored as (in_features, out_features) == W_pt.T
    w = jax.random.normal(k3, (H, H), dtype=jnp.float32) * (1.0 / jnp.sqrt(H))
    b = jax.random.normal(k4, (H,), dtype=jnp.float32) * 0.02
    gamma = jnp.ones((H,), dtype=jnp.float32) + 0.01 * jax.random.normal(k5, (H,))
    beta = jnp.zeros((H,), dtype=jnp.float32)

    out = layoutlmv2_self_output(hidden_states, input_tensor, w, b, gamma, beta,
                                 eps=eps)
    out = jax.block_until_ready(out)

    ref = _reference(hidden_states, input_tensor, w, b, gamma, beta, eps=eps)
    assert out.shape == (B, S, H)
    assert jnp.allclose(out, ref, atol=2e-3, rtol=2e-3), "mismatch vs reference"

    # Second check: row count not a multiple of 8 -> exercises the zero-pad path.
    hs2 = hidden_states[:, :5, :]
    it2 = input_tensor[:, :5, :]
    out2 = jax.block_until_ready(
        layoutlmv2_self_output(hs2, it2, w, b, gamma, beta, eps=eps))
    ref2 = _reference(hs2, it2, w, b, gamma, beta, eps=eps)
    assert out2.shape == (B, 5, H)
    assert jnp.allclose(out2, ref2, atol=2e-3, rtol=2e-3), "mismatch vs reference (padded)"

    print("KERNEL_OK")
</pallas_src>

<mosaic_0001>
module attributes {stable_mosaic.version = 11 : i64} {
  func.func @_self_output_kernel(%arg0: i32, %arg1: memref<16x32xbf16, #tpu.memory_space<vmem>>, %arg2: memref<32x32xbf16, #tpu.memory_space<vmem>>, %arg3: memref<1x32xf32, #tpu.memory_space<vmem>>, %arg4: memref<16x32xf32, #tpu.memory_space<vmem>>, %arg5: memref<1x32xf32, #tpu.memory_space<vmem>>, %arg6: memref<1x32xf32, #tpu.memory_space<vmem>>, %arg7: memref<16x32xf32, #tpu.memory_space<vmem>>) attributes {dimension_semantics = [#tpu.dimension_semantics<parallel>], iteration_bounds = array<i64: 1>, scalar_prefetch = 0 : i64, scratch_operands = 0 : i64, tpu.core_type = #tpu.core_type<tc>, window_params = [{transform_indices = @transform_0, window_bounds = array<i64: 16, 32>}, {pipeline_mode = #tpu.pipeline_mode<synchronous>, transform_indices = @transform_1, window_bounds = array<i64: 32, 32>}, {pipeline_mode = #tpu.pipeline_mode<synchronous>, transform_indices = @transform_2, window_bounds = array<i64: 1, 32>}, {transform_indices = @transform_3, window_bounds = array<i64: 16, 32>}, {pipeline_mode = #tpu.pipeline_mode<synchronous>, transform_indices = @transform_4, window_bounds = array<i64: 1, 32>}, {pipeline_mode = #tpu.pipeline_mode<synchronous>, transform_indices = @transform_5, window_bounds = array<i64: 1, 32>}, {transform_indices = @transform_6, window_bounds = array<i64: 16, 32>}]} {
    %c0 = arith.constant 0 : index
    %c0_0 = arith.constant 0 : index
    %0 = vector.load %arg1[%c0, %c0_0] : memref<16x32xbf16, #tpu.memory_space<vmem>>, vector<16x32xbf16>
    %c0_1 = arith.constant 0 : index
    %c0_2 = arith.constant 0 : index
    %1 = vector.load %arg2[%c0_1, %c0_2] : memref<32x32xbf16, #tpu.memory_space<vmem>>, vector<32x32xbf16>
    %cst = arith.constant dense<0.000000e+00> : vector<16x32xf32>
    %2 = tpu.matmul %0, %1, %cst {dimension_numbers = #tpu.dot_dimension_numbers<[1], [0], [0], [1], [0, 0, 1, 1], [], []>} : vector<16x32xbf16>, vector<32x32xbf16>, vector<16x32xf32> -> vector<16x32xf32>
    %c0_3 = arith.constant 0 : index
    %c0_4 = arith.constant 0 : index
    %3 = vector.load %arg3[%c0_3, %c0_4] : memref<1x32xf32, #tpu.memory_space<vmem>>, vector<1x32xf32>
    %c0_5 = arith.constant 0 : index
    %c0_6 = arith.constant 0 : index
    %4 = vector.load %arg4[%c0_5, %c0_6] : memref<16x32xf32, #tpu.memory_space<vmem>>, vector<16x32xf32>
    %c0_7 = arith.constant 0 : index
    %c0_8 = arith.constant 0 : index
    %5 = vector.load %arg5[%c0_7, %c0_8] : memref<1x32xf32, #tpu.memory_space<vmem>>, vector<1x32xf32>
    %c0_9 = arith.constant 0 : index
    %c0_10 = arith.constant 0 : index
    %6 = vector.load %arg6[%c0_9, %c0_10] : memref<1x32xf32, #tpu.memory_space<vmem>>, vector<1x32xf32>
    %7 = vector.broadcast %3 : vector<1x32xf32> to vector<16x32xf32>
    %8 = arith.addf %2, %7 : vector<16x32xf32>
    %9 = arith.addf %8, %4 : vector<16x32xf32>
    %cst_11 = arith.constant dense<0.000000e+00> : vector<16xf32>
    %10 = vector.multi_reduction <add>, %9, %cst_11 [1] : vector<16x32xf32> to vector<16xf32>
    %11 = vector.shape_cast %10 : vector<16xf32> to vector<16x1xf32>
    %cst_12 = arith.constant 3.200000e+01 : f32
    %12 = vector.broadcast %cst_12 : f32 to vector<16x1xf32>
    %13 = arith.divf %11, %12 : vector<16x1xf32>
    %14 = vector.broadcast %13 : vector<16x1xf32> to vector<16x32xf32>
    %15 = arith.subf %9, %14 : vector<16x32xf32>
    %16 = arith.mulf %15, %15 : vector<16x32xf32>
    %cst_13 = arith.constant dense<0.000000e+00> : vector<16xf32>
    %17 = vector.multi_reduction <add>, %16, %cst_13 [1] : vector<16x32xf32> to vector<16xf32>
    %18 = vector.shape_cast %17 : vector<16xf32> to vector<16x1xf32>
    %cst_14 = arith.constant 3.200000e+01 : f32
    %19 = vector.broadcast %cst_14 : f32 to vector<16x1xf32>
    %20 = arith.divf %18, %19 : vector<16x1xf32>
    %cst_15 = arith.constant 9.99999996E-13 : f32
    %21 = vector.broadcast %cst_15 : f32 to vector<16x1xf32>
    %22 = arith.addf %20, %21 : vector<16x1xf32>
    %23 = math.rsqrt %22 : vector<16x1xf32>
    %24 = vector.broadcast %23 : vector<16x1xf32> to vector<16x32xf32>
    %25 = arith.mulf %15, %24 : vector<16x32xf32>
    %26 = vector.broadcast %5 : vector<1x32xf32> to vector<16x32xf32>
    %27 = arith.mulf %25, %26 : vector<16x32xf32>
    %28 = vector.broadcast %6 : vector<1x32xf32> to vector<16x32xf32>
    %29 = arith.addf %27, %28 : vector<16x32xf32>
    %c0_16 = arith.constant 0 : index
    %c0_17 = arith.constant 0 : index
    %30 = vector.load %arg7[%c0_16, %c0_17] : memref<16x32xf32, #tpu.memory_space<vmem>>, vector<16x32xf32>
    tpu.vector_store %arg7[%c0_16, %c0_17], %29 {strides = array<i32>} : memref<16x32xf32, #tpu.memory_space<vmem>>, vector<16x32xf32>,
    return
  }
  func.func @transform_0(%arg0: i32) -> (i32, i32) {
    %c0_i32 = arith.constant 0 : i32
    %c0_i32_0 = arith.constant 0 : i32
    return %arg0, %c0_i32 : i32, i32
  }
  func.func @transform_1(%arg0: i32) -> (i32, i32) {
    %c0_i32 = arith.constant 0 : i32
    %c0_i32_0 = arith.constant 0 : i32
    %c0_i32_1 = arith.constant 0 : i32
    return %c0_i32, %c0_i32_0 : i32, i32
  }
  func.func @transform_2(%arg0: i32) -> (i32, i32) {
    %c0_i32 = arith.constant 0 : i32
    %c0_i32_0 = arith.constant 0 : i32
    %c0_i32_1 = arith.constant 0 : i32
    return %c0_i32, %c0_i32_0 : i32, i32
  }
  func.func @transform_3(%arg0: i32) -> (i32, i32) {
    %c0_i32 = arith.constant 0 : i32
    %c0_i32_0 = arith.constant 0 : i32
    return %arg0, %c0_i32 : i32, i32
  }
  func.func @transform_4(%arg0: i32) -> (i32, i32) {
    %c0_i32 = arith.constant 0 : i32
    %c0_i32_0 = arith.constant 0 : i32
    %c0_i32_1 = arith.constant 0 : i32
    return %c0_i32, %c0_i32_0 : i32, i32
  }
  func.func @transform_5(%arg0: i32) -> (i32, i32) {
    %c0_i32 = arith.constant 0 : i32
    %c0_i32_0 = arith.constant 0 : i32
    %c0_i32_1 = arith.constant 0 : i32
    return %c0_i32, %c0_i32_0 : i32, i32
  }
  func.func @transform_6(%arg0: i32) -> (i32, i32) {
    %c0_i32 = arith.constant 0 : i32
    %c0_i32_0 = arith.constant 0 : i32
    return %arg0, %c0_i32 : i32, i32
  }
}

module attributes {stable_mosaic.version = 11 : i64} {
  func.func @_self_output_kernel(%arg0: i32, %arg1: memref<16x32xbf16, #tpu.memory_space<vmem>>, %arg2: memref<32x32xbf16, #tpu.memory_space<vmem>>, %arg3: memref<1x32xf32, #tpu.memory_space<vmem>>, %arg4: memref<16x32xf32, #tpu.memory_space<vmem>>, %arg5: memref<1x32xf32, #tpu.memory_space<vmem>>, %arg6: memref<1x32xf32, #tpu.memory_space<vmem>>, %arg7: memref<16x32xf32, #tpu.memory_space<vmem>>) attributes {dimension_semantics = [#tpu.dimension_semantics<parallel>], iteration_bounds = array<i64: 1>, scalar_prefetch = 0 : i64, scratch_operands = 0 : i64, tpu.core_type = #tpu.core_type<tc>, window_params = [{transform_indices = @transform_0, window_bounds = array<i64: 16, 32>}, {pipeline_mode = #tpu.pipeline_mode<synchronous>, transform_indices = @transform_1, window_bounds = array<i64: 32, 32>}, {pipeline_mode = #tpu.pipeline_mode<synchronous>, transform_indices = @transform_2, window_bounds = array<i64: 1, 32>}, {transform_indices = @transform_3, window_bounds = array<i64: 16, 32>}, {pipeline_mode = #tpu.pipeline_mode<synchronous>, transform_indices = @transform_4, window_bounds = array<i64: 1, 32>}, {pipeline_mode = #tpu.pipeline_mode<synchronous>, transform_indices = @transform_5, window_bounds = array<i64: 1, 32>}, {transform_indices = @transform_6, window_bounds = array<i64: 16, 32>}]} {
    %c0 = arith.constant 0 : index
    %c0_0 = arith.constant 0 : index
    %0 = vector.load %arg1[%c0, %c0_0] : memref<16x32xbf16, #tpu.memory_space<vmem>>, vector<16x32xbf16>
    %c0_1 = arith.constant 0 : index
    %c0_2 = arith.constant 0 : index
    %1 = vector.load %arg2[%c0_1, %c0_2] : memref<32x32xbf16, #tpu.memory_space<vmem>>, vector<32x32xbf16>
    %cst = arith.constant dense<0.000000e+00> : vector<16x32xf32>
    %2 = tpu.matmul %0, %1, %cst {dimension_numbers = #tpu.dot_dimension_numbers<[1], [0], [0], [1], [0, 0, 1, 1], [], []>} : vector<16x32xbf16>, vector<32x32xbf16>, vector<16x32xf32> -> vector<16x32xf32>
    %c0_3 = arith.constant 0 : index
    %c0_4 = arith.constant 0 : index
    %3 = vector.load %arg3[%c0_3, %c0_4] : memref<1x32xf32, #tpu.memory_space<vmem>>, vector<1x32xf32>
    %c0_5 = arith.constant 0 : index
    %c0_6 = arith.constant 0 : index
    %4 = vector.load %arg4[%c0_5, %c0_6] : memref<16x32xf32, #tpu.memory_space<vmem>>, vector<16x32xf32>
    %c0_7 = arith.constant 0 : index
    %c0_8 = arith.constant 0 : index
    %5 = vector.load %arg5[%c0_7, %c0_8] : memref<1x32xf32, #tpu.memory_space<vmem>>, vector<1x32xf32>
    %c0_9 = arith.constant 0 : index
    %c0_10 = arith.constant 0 : index
    %6 = vector.load %arg6[%c0_9, %c0_10] : memref<1x32xf32, #tpu.memory_space<vmem>>, vector<1x32xf32>
    %7 = vector.broadcast %3 : vector<1x32xf32> to vector<16x32xf32>
    %8 = arith.addf %2, %7 : vector<16x32xf32>
    %9 = arith.addf %8, %4 : vector<16x32xf32>
    %cst_11 = arith.constant dense<0.000000e+00> : vector<16xf32>
    %10 = vector.multi_reduction <add>, %9, %cst_11 [1] : vector<16x32xf32> to vector<16xf32>
    %11 = vector.shape_cast %10 : vector<16xf32> to vector<16x1xf32>
    %cst_12 = arith.constant 3.200000e+01 : f32
    %12 = vector.broadcast %cst_12 : f32 to vector<16x1xf32>
    %13 = arith.divf %11, %12 : vector<16x1xf32>
    %14 = vector.broadcast %13 : vector<16x1xf32> to vector<16x32xf32>
    %15 = arith.subf %9, %14 : vector<16x32xf32>
    %16 = arith.mulf %15, %15 : vector<16x32xf32>
    %cst_13 = arith.constant dense<0.000000e+00> : vector<16xf32>
    %17 = vector.multi_reduction <add>, %16, %cst_13 [1] : vector<16x32xf32> to vector<16xf32>
    %18 = vector.shape_cast %17 : vector<16xf32> to vector<16x1xf32>
    %cst_14 = arith.constant 3.200000e+01 : f32
    %19 = vector.broadcast %cst_14 : f32 to vector<16x1xf32>
    %20 = arith.divf %18, %19 : vector<16x1xf32>
    %cst_15 = arith.constant 9.99999996E-13 : f32
    %21 = vector.broadcast %cst_15 : f32 to vector<16x1xf32>
    %22 = arith.addf %20, %21 : vector<16x1xf32>
    %23 = math.rsqrt %22 : vector<16x1xf32>
    %24 = vector.broadcast %23 : vector<16x1xf32> to vector<16x32xf32>
    %25 = arith.mulf %15, %24 : vector<16x32xf32>
    %26 = vector.broadcast %5 : vector<1x32xf32> to vector<16x32xf32>
    %27 = arith.mulf %25, %26 : vector<16x32xf32>
    %28 = vector.broadcast %6 : vector<1x32xf32> to vector<16x32xf32>
    %29 = arith.addf %27, %28 : vector<16x32xf32>
    %c0_16 = arith.constant 0 : index
    %c0_17 = arith.constant 0 : index
    %30 = vector.load %arg7[%c0_16, %c0_17] : memref<16x32xf32, #tpu.memory_space<vmem>>, vector<16x32xf32>
    tpu.vector_store %arg7[%c0_16, %c0_17], %29 {strides = array<i32>} : memref<16x32xf32, #tpu.memory_space<vmem>>, vector<16x32xf32>,
    return
  }
  func.func @transform_0(%arg0: i32) -> (i32, i32) {
    %c0_i32 = arith.constant 0 : i32
    %c0_i32_0 = arith.constant 0 : i32
    return %arg0, %c0_i32 : i32, i32
  }
  func.func @transform_1(%arg0: i32) -> (i32, i32) {
    %c0_i32 = arith.constant 0 : i32
    %c0_i32_0 = arith.constant 0 : i32
    %c0_i32_1 = arith.constant 0 : i32
    return %c0_i32, %c0_i32_0 : i32, i32
  }
  func.func @transform_2(%arg0: i32) -> (i32, i32) {
    %c0_i32 = arith.constant 0 : i32
    %c0_i32_0 = arith.constant 0 : i32
    %c0_i32_1 = arith.constant 0 : i32
    return %c0_i32, %c0_i32_0 : i32, i32
  }
  func.func @transform_3(%arg0: i32) -> (i32, i32) {
    %c0_i32 = arith.constant 0 : i32
    %c0_i32_0 = arith.constant 0 : i32
    return %arg0, %c0_i32 : i32, i32
  }
  func.func @transform_4(%arg0: i32) -> (i32, i32) {
    %c0_i32 = arith.constant 0 : i32
    %c0_i32_0 = arith.constant 0 : i32
    %c0_i32_1 = arith.constant 0 : i32
    return %c0_i32, %c0_i32_0 : i32, i32
  }
  func.func @transform_5(%arg0: i32) -> (i32, i32) {
    %c0_i32 = arith.constant 0 : i32
    %c0_i32_0 = arith.constant 0 : i32
    %c0_i32_1 = arith.constant 0 : i32
    return %c0_i32, %c0_i32_0 : i32, i32
  }
  func.func @transform_6(%arg0: i32) -> (i32, i32) {
    %c0_i32 = arith.constant 0 : i32
    %c0_i32_0 = arith.constant 0 : i32
    return %arg0, %c0_i32 : i32, i32
  }
}

</mosaic_0001>

<bundles_post_ra>
// kernel: tpu_custom_call.1
= control target key start
LH: loop header
LB: loop body
LE: loop exit
PB: predicated region body
PF: predicated region fallthrough
CT: control target
= control target key end

     0   :  { %11 = vsyncpa [#allocation3], 0  ;;  %s420_s0 = inlined_call_operand.hbm [shape: bf16[16,32], index: 0, kind: input, shape index: {}]   ;;  %s421_s1 = inlined_call_operand.hbm [shape: bf16[32,32], index: 1, kind: input, shape index: {}]   ;;  %s422_s2 = inlined_call_operand.vmem [shape: f32[1,32], index: 2, kind: input, shape index: {}]   ;;  %s423_s3 = inlined_call_operand.hbm [shape: f32[16,32], index: 3, kind: input, shape index: {}]   ;;  %s424_s4 = inlined_call_operand.vmem [shape: f32[1,32], index: 4, kind: input, shape index: {}]   ;;  %s425_s5 = inlined_call_operand.vmem [shape: f32[1,32], index: 5, kind: input, shape index: {}]   ;;  %s426_s6 = inlined_call_operand.hbm [shape: f32[16,32], index: 6, kind: output, shape index: {}]  }
   0x1   :  { %12 = vsyncpa [#allocation6], 0 }
   0x2   :  { %13 = vsyncpa [#allocation4], 0  ;;  %s31_s23 = sshll.u32 %s421_s1, 4  ;;  %s342_s24 = smov [#allocation5]   ;;  %s32_s23 = int_to_ptr.hbm [resolvable:$true] %s31_s23 }
   0x3   :  { %s33_s25 = sshll.u32 %s342_s24, 4  ;;  %s18_s28 = sshll.u32 %s420_s0, 4  ;;  %s34_s25 = int_to_ptr.vmem [resolvable:$true] %s33_s25  ;;  %s19_s28 = int_to_ptr.hbm [resolvable:$true] %s18_s28 }
   0x4   :  { %s343_s29 = smov 64   ;;  %s344_s30 = smov 4  }
   0x5   :  { %39 = dma.hbm_to_vmem [thread:$0]  %s32_s23, 256, %s34_s25, [#allocation6], %s343_s29, %s343_s29, %s344_s30  }
   0x6   :  { %s345_s7 = smov [#allocation2]   ;;  %s46_s11 = sshll.u32 %s423_s3, 4  ;;  %s47_s11 = int_to_ptr.hbm [resolvable:$true] %s46_s11 }
   0x7   :  { %s20_s8 = sshll.u32 %s345_s7, 4  ;;  %s346_s1 = smov [#allocation7]   ;;  %s21_s8 = int_to_ptr.vmem [resolvable:$true] %s20_s8 }
   0x8   :  { %26 = dma.hbm_to_vmem [thread:$0]  %s19_s28, 128, %s21_s8, [#allocation3], %s343_s29, %s343_s29, %s344_s30  }
   0x9   :  { %s48_s12 = sshll.u32 %s346_s1, 4  ;;  %s347_s13 = smov 128   ;;  %s49_s12 = int_to_ptr.vmem [resolvable:$true] %s48_s12 }
   0xa   :  { %s348_s14 = smov 8  }
   0xb   :  { %54 = dma.hbm_to_vmem [thread:$0]  %s47_s11, 256, %s49_s12, [#allocation6], %s347_s13, %s347_s13, %s348_s14  }
   0xc   :  { %336 = dma.done.wait [#allocation3], 128  }
   0xd   :  { %337 = vsyncadd [#allocation3], 4294967168 }
   0xe   :  { %338 = dma.done.wait [#allocation6], 512  }
   0xf   :  { %339 = vsyncadd [#allocation6], 4294966784  ;;  %v221_v0 = vld [vmem:[#allocation5 + $0x8] sm:$0xff]  ;;  %v220_v1 = vld [vmem:[#allocation5] sm:$0xff]  ;;  %vm103_vm0 = vcmask 261120   ;;  %v349_v14 = vmov 32.0  }
  0x10   :  { %113 = vmatpush.bf16.msra.mxu0 %v221_v0  ;;  %v219_v2 = vld [vmem:[#allocation2] sm:$0xff]  ;;  %v79_v5 = vld [vmem:[#allocation7] sm:$0xff]  ;;  %234 = vrcp.f32 %v349_v14  ;;  %s192_s21 = sshll.u32 %s426_s6, 4  ;;  %s193_s21 = int_to_ptr.hbm [resolvable:$true] %s192_s21 }
  0x11   :  { %v231_v3 = vld [vmem:[%s422_s2] ss:$0 sm:$0xff] }
  0x12   :  { %v80_v10 = vld [vmem:[#allocation7 + $0x8] sm:$0xff] }
  0x13   :  { %v232_v45 = vld [vmem:[%s424_s4] ss:$0 sm:$0xff]  ;;  %s350_s4 = smov [#allocation8]  }
  0x14   :  { %114 = vmatpush.bf16.msra.mxu0 %v220_v1  ;;  %v233_v49 = vld [vmem:[%s425_s5] ss:$0 sm:$0xff]  ;;  %s190_s18 = sshll.u32 %s350_s4, 4  ;;  %s191_s18 = int_to_ptr.vmem [resolvable:$true] %s190_s18 }
  0x16   :  { %v235_v15 = vpop.eup %234 }
  0x17   :  { %218 = vmatmul.msk.bf16.vlgmr.msra.gmra.mxu0 %vm103_vm0, %v219_v2  ;;  %v130_v16 = vmul.f32 32.0, %v235_v15  ;;  %vm134_vm1 = vweird.f32 %v235_v15 }
  0x19   :  { %v131_v17 = vsub.f32 1.0, %v130_v16 }
  0x1b   :  { %v132_v18 = vmul.f32 %v235_v15, %v131_v17 }
  0x1d   :  { %v133_v19 = vadd.f32 %v235_v15, %v132_v18 }
  0x1f   :  { %v135_v20 = vsel %vm134_vm1, %v235_v15, %v133_v19 }
  0x94   :  { %v116_v4 = vpop.f32.mrf.mxu0 }
  0x95   :  { %v117_v6 = vadd.f32 %v231_v3, %v116_v4 }
  0x97   :  { %v121_v7 = vadd.f32 %v117_v6, %v79_v5 }
  0x99   :  { %v123_v8 = vsel %vm103_vm0, %v121_v7, 0.0 }
  0x9a   :  { %124 = vadd.xlane.f32.xlu0 %v123_v8 }
  0x9c   :  { %v118_v9 = vpop.f32.mrf.mxu0 }
  0x9d   :  { %v119_v11 = vadd.f32 %v231_v3, %v118_v9 }
  0x9f   :  { %v122_v12 = vadd.f32 %v119_v11, %v80_v10 }
  0xa1   :  { %v126_v13 = vsel %vm103_vm0, %v122_v12, 0.0 }
  0xa2   :  { %127 = vadd.xlane.f32.xlu0 %v126_v13 }
 0x10d   :  { %v125_v21 = vpop.xlane.xlu0 %124 }
 0x10e   :  { %v136_v22 = vmul.f32 %v135_v20, %v125_v21 }
 0x110   :  { %v138_v23 = vsub.f32 %v121_v7, %v136_v22 }
 0x112   :  { %v140_v24 = vmul.f32 %v138_v23, %v138_v23 }
 0x114   :  { %v142_v25 = vsel %vm103_vm0, %v140_v24, 0.0 }
 0x115   :  { %143 = vadd.xlane.f32.xlu1 %v142_v25  ;;  %v128_v26 = vpop.xlane.xlu0 %127 }
 0x116   :  { %v137_v27 = vmul.f32 %v135_v20, %v128_v26 }
 0x118   :  { %v139_v28 = vsub.f32 %v122_v12, %v137_v27 }
 0x11a   :  { %v141_v29 = vmul.f32 %v139_v28, %v139_v28 }
 0x11c   :  { %v145_v30 = vsel %vm103_vm0, %v141_v29, 0.0 }
 0x11d   :  { %146 = vadd.xlane.f32.xlu1 %v145_v30 }
 0x188   :  { %v144_v31 = vpop.xlane.xlu1 %143 }
 0x189   :  { %v148_v32 = vmul.f32 %v144_v31, %v135_v20 }
 0x18b   :  { %v150_v33 = vadd.f32 1e-12, %v148_v32 }
 0x18d   :  { %236 = vrsqrt.f32 %v150_v33  ;;  %vm158_vm3 = vweird.f32 %v150_v33 }
 0x190   :  { %v147_v34 = vpop.xlane.xlu1 %146 }
 0x191   :  { %v149_v35 = vmul.f32 %v147_v34, %v135_v20 }
 0x193   :  { %v237_v36 = vpop.eup %236  ;;  %v151_v37 = vadd.f32 1e-12, %v149_v35 }
 0x194   :  { %v153_v38 = vmul.f32 %v237_v36, %v150_v33  ;;  %vm159_vm2 = vweird.f32 %v237_v36 }
 0x195   :  { %238 = vrsqrt.f32 %v151_v37  ;;  %vm160_vm4 = vmor %vm158_vm3, %vm159_vm2  ;;  %vm168_vm6 = vweird.f32 %v151_v37 }
 0x196   :  { %v154_v39 = vmul.f32 %v237_v36, %v153_v38 }
 0x198   :  { %v155_v40 = vmul.f32 0.5, %v154_v39 }
 0x19a   :  { %v156_v41 = vsub.f32 1.5, %v155_v40 }
 0x19b   :  { %v239_v42 = vpop.eup %238 }
 0x19c   :  { %v157_v43 = vmul.f32 %v237_v36, %v156_v41  ;;  %v163_v44 = vmul.f32 %v239_v42, %v151_v37  ;;  %vm169_vm5 = vweird.f32 %v239_v42 }
 0x19d   :  { %vm170_vm7 = vmor %vm168_vm6, %vm169_vm5 }
 0x19e   :  { %v161_v46 = vsel %vm160_vm4, %v237_v36, %v157_v43  ;;  %v164_v47 = vmul.f32 %v239_v42, %v163_v44 }
 0x19f   :  { %v172_v48 = vmul.f32 %v161_v46, %v138_v23 }
 0x1a0   :  { %v165_v50 = vmul.f32 0.5, %v164_v47 }
 0x1a1   :  { %v177_v51 = vmul.f32 %v232_v45, %v172_v48 }
 0x1a2   :  { %v166_v52 = vsub.f32 1.5, %v165_v50 }
 0x1a3   :  { %v182_v53 = vadd.f32 %v233_v49, %v177_v51 }
 0x1a4   :  { %v167_v54 = vmul.f32 %v239_v42, %v166_v52 }
 0x1a5   :  { %184 = vst.msk [vmem:[#allocation8] sm:$0xff] %vm103_vm0, %v182_v53 }
 0x1a6   :  { %v171_v55 = vsel %vm170_vm7, %v239_v42, %v167_v54 }
 0x1a7   :  { %v173_v56 = vmul.f32 %v171_v55, %v139_v28 }
 0x1a9   :  { %v178_v57 = vmul.f32 %v232_v45, %v173_v56 }
 0x1ab   :  { %v183_v58 = vadd.f32 %v233_v49, %v178_v57 }
 0x1ad   :  { %185 = vst.msk [vmem:[#allocation8 + $0x8] sm:$0xff] %vm103_vm0, %v183_v58 }
 0x1ae   :  { %198 = dma.vmem_to_hbm [thread:$0]  %s191_s18, 256, %s193_s21, [#allocation4], %s347_s13, %s347_s13, %s348_s14  }
 0x1af   :  { %340 = dma.done.wait [#allocation4], 256  }
 0x1b0   :  { %341 = vsyncadd [#allocation4], 4294967040 }
 0x1b1   :  { %203 = vsyncpa [#allocation3], 1 }
 0x1b2   :  { %204 = vsyncpa [#allocation6], 1 }
 0x1b3   :  { %205 = vsyncpa [#allocation4], 1 }

// kernel: tpu_custom_call.1
= control target key start
LH: loop header
LB: loop body
LE: loop exit
PB: predicated region body
PF: predicated region fallthrough
CT: control target
= control target key end

     0   :  { %11 = vsyncpa [#allocation3], 0  ;;  %s420_s0 = inlined_call_operand.hbm [shape: bf16[16,32], index: 0, kind: input, shape index: {}]   ;;  %s421_s1 = inlined_call_operand.hbm [shape: bf16[32,32], index: 1, kind: input, shape index: {}]   ;;  %s422_s2 = inlined_call_operand.vmem [shape: f32[1,32], index: 2, kind: input, shape index: {}]   ;;  %s423_s3 = inlined_call_operand.hbm [shape: f32[16,32], index: 3, kind: input, shape index: {}]   ;;  %s424_s4 = inlined_call_operand.vmem [shape: f32[1,32], index: 4, kind: input, shape index: {}]   ;;  %s425_s5 = inlined_call_operand.vmem [shape: f32[1,32], index: 5, kind: input, shape index: {}]   ;;  %s426_s6 = inlined_call_operand.hbm [shape: f32[16,32], index: 6, kind: output, shape index: {}]  }
   0x1   :  { %12 = vsyncpa [#allocation6], 0 }
   0x2   :  { %13 = vsyncpa [#allocation4], 0  ;;  %s31_s23 = sshll.u32 %s421_s1, 4  ;;  %s342_s24 = smov [#allocation5]   ;;  %s32_s23 = int_to_ptr.hbm [resolvable:$true] %s31_s23 }
   0x3   :  { %s33_s25 = sshll.u32 %s342_s24, 4  ;;  %s18_s28 = sshll.u32 %s420_s0, 4  ;;  %s34_s25 = int_to_ptr.vmem [resolvable:$true] %s33_s25  ;;  %s19_s28 = int_to_ptr.hbm [resolvable:$true] %s18_s28 }
   0x4   :  { %s343_s29 = smov 64   ;;  %s344_s30 = smov 4  }
   0x5   :  { %39 = dma.hbm_to_vmem [thread:$0]  %s32_s23, 256, %s34_s25, [#allocation6], %s343_s29, %s343_s29, %s344_s30  }
   0x6   :  { %s345_s7 = smov [#allocation2]   ;;  %s46_s11 = sshll.u32 %s423_s3, 4  ;;  %s47_s11 = int_to_ptr.hbm [resolvable:$true] %s46_s11 }
   0x7   :  { %s20_s8 = sshll.u32 %s345_s7, 4  ;;  %s346_s1 = smov [#allocation7]   ;;  %s21_s8 = int_to_ptr.vmem [resolvable:$true] %s20_s8 }
   0x8   :  { %26 = dma.hbm_to_vmem [thread:$0]  %s19_s28, 128, %s21_s8, [#allocation3], %s343_s29, %s343_s29, %s344_s30  }
   0x9   :  { %s48_s12 = sshll.u32 %s346_s1, 4  ;;  %s347_s13 = smov 128   ;;  %s49_s12 = int_to_ptr.vmem [resolvable:$true] %s48_s12 }
   0xa   :  { %s348_s14 = smov 8  }
   0xb   :  { %54 = dma.hbm_to_vmem [thread:$0]  %s47_s11, 256, %s49_s12, [#allocation6], %s347_s13, %s347_s13, %s348_s14  }
   0xc   :  { %336 = dma.done.wait [#allocation3], 128  }
   0xd   :  { %337 = vsyncadd [#allocation3], 4294967168 }
   0xe   :  { %338 = dma.done.wait [#allocation6], 512  }
   0xf   :  { %339 = vsyncadd [#allocation6], 4294966784  ;;  %v221_v0 = vld [vmem:[#allocation5 + $0x8] sm:$0xff]  ;;  %v220_v1 = vld [vmem:[#allocation5] sm:$0xff]  ;;  %vm103_vm0 = vcmask 261120   ;;  %v349_v14 = vmov 32.0  }
  0x10   :  { %113 = vmatpush.bf16.msra.mxu0 %v221_v0  ;;  %v219_v2 = vld [vmem:[#allocation2] sm:$0xff]  ;;  %v79_v5 = vld [vmem:[#allocation7] sm:$0xff]  ;;  %234 = vrcp.f32 %v349_v14  ;;  %s192_s21 = sshll.u32 %s426_s6, 4  ;;  %s193_s21 = int_to_ptr.hbm [resolvable:$true] %s192_s21 }
  0x11   :  { %v231_v3 = vld [vmem:[%s422_s2] ss:$0 sm:$0xff] }
  0x12   :  { %v80_v10 = vld [vmem:[#allocation7 + $0x8] sm:$0xff] }
  0x13   :  { %v232_v45 = vld [vmem:[%s424_s4] ss:$0 sm:$0xff]  ;;  %s350_s4 = smov [#allocation8]  }
  0x14   :  { %114 = vmatpush.bf16.msra.mxu0 %v220_v1  ;;  %v233_v49 = vld [vmem:[%s425_s5] ss:$0 sm:$0xff]  ;;  %s190_s18 = sshll.u32 %s350_s4, 4  ;;  %s191_s18 = int_to_ptr.vmem [resolvable:$true] %s190_s18 }
  0x16   :  { %v235_v15 = vpop.eup %234 }
  0x17   :  { %218 = vmatmul.msk.bf16.vlgmr.msra.gmra.mxu0 %vm103_vm0, %v219_v2  ;;  %v130_v16 = vmul.f32 32.0, %v235_v15  ;;  %vm134_vm1 = vweird.f32 %v235_v15 }
  0x19   :  { %v131_v17 = vsub.f32 1.0, %v130_v16 }
  0x1b   :  { %v132_v18 = vmul.f32 %v235_v15, %v131_v17 }
  0x1d   :  { %v133_v19 = vadd.f32 %v235_v15, %v132_v18 }
  0x1f   :  { %v135_v20 = vsel %vm134_vm1, %v235_v15, %v133_v19 }
  0x94   :  { %v116_v4 = vpop.f32.mrf.mxu0 }
  0x95   :  { %v117_v6 = vadd.f32 %v231_v3, %v116_v4 }
  0x97   :  { %v121_v7 = vadd.f32 %v117_v6, %v79_v5 }
  0x99   :  { %v123_v8 = vsel %vm103_vm0, %v121_v7, 0.0 }
  0x9a   :  { %124 = vadd.xlane.f32.xlu0 %v123_v8 }
  0x9c   :  { %v118_v9 = vpop.f32.mrf.mxu0 }
  0x9d   :  { %v119_v11 = vadd.f32 %v231_v3, %v118_v9 }
  0x9f   :  { %v122_v12 = vadd.f32 %v119_v11, %v80_v10 }
  0xa1   :  { %v126_v13 = vsel %vm103_vm0, %v122_v12, 0.0 }
  0xa2   :  { %127 = vadd.xlane.f32.xlu0 %v126_v13 }
 0x10d   :  { %v125_v21 = vpop.xlane.xlu0 %124 }
 0x10e   :  { %v136_v22 = vmul.f32 %v135_v20, %v125_v21 }
 0x110   :  { %v138_v23 = vsub.f32 %v121_v7, %v136_v22 }
 0x112   :  { %v140_v24 = vmul.f32 %v138_v23, %v138_v23 }
 0x114   :  { %v142_v25 = vsel %vm103_vm0, %v140_v24, 0.0 }
 0x115   :  { %143 = vadd.xlane.f32.xlu1 %v142_v25  ;;  %v128_v26 = vpop.xlane.xlu0 %127 }
 0x116   :  { %v137_v27 = vmul.f32 %v135_v20, %v128_v26 }
 0x118   :  { %v139_v28 = vsub.f32 %v122_v12, %v137_v27 }
 0x11a   :  { %v141_v29 = vmul.f32 %v139_v28, %v139_v28 }
 0x11c   :  { %v145_v30 = vsel %vm103_vm0, %v141_v29, 0.0 }
 0x11d   :  { %146 = vadd.xlane.f32.xlu1 %v145_v30 }
 0x188   :  { %v144_v31 = vpop.xlane.xlu1 %143 }
 0x189   :  { %v148_v32 = vmul.f32 %v144_v31, %v135_v20 }
 0x18b   :  { %v150_v33 = vadd.f32 1e-12, %v148_v32 }
 0x18d   :  { %236 = vrsqrt.f32 %v150_v33  ;;  %vm158_vm3 = vweird.f32 %v150_v33 }
 0x190   :  { %v147_v34 = vpop.xlane.xlu1 %146 }
 0x191   :  { %v149_v35 = vmul.f32 %v147_v34, %v135_v20 }
 0x193   :  { %v237_v36 = vpop.eup %236  ;;  %v151_v37 = vadd.f32 1e-12, %v149_v35 }
 0x194   :  { %v153_v38 = vmul.f32 %v237_v36, %v150_v33  ;;  %vm159_vm2 = vweird.f32 %v237_v36 }
 0x195   :  { %238 = vrsqrt.f32 %v151_v37  ;;  %vm160_vm4 = vmor %vm158_vm3, %vm159_vm2  ;;  %vm168_vm6 = vweird.f32 %v151_v37 }
 0x196   :  { %v154_v39 = vmul.f32 %v237_v36, %v153_v38 }
 0x198   :  { %v155_v40 = vmul.f32 0.5, %v154_v39 }
 0x19a   :  { %v156_v41 = vsub.f32 1.5, %v155_v40 }
 0x19b   :  { %v239_v42 = vpop.eup %238 }
 0x19c   :  { %v157_v43 = vmul.f32 %v237_v36, %v156_v41  ;;  %v163_v44 = vmul.f32 %v239_v42, %v151_v37  ;;  %vm169_vm5 = vweird.f32 %v239_v42 }
 0x19d   :  { %vm170_vm7 = vmor %vm168_vm6, %vm169_vm5 }
 0x19e   :  { %v161_v46 = vsel %vm160_vm4, %v237_v36, %v157_v43  ;;  %v164_v47 = vmul.f32 %v239_v42, %v163_v44 }
 0x19f   :  { %v172_v48 = vmul.f32 %v161_v46, %v138_v23 }
 0x1a0   :  { %v165_v50 = vmul.f32 0.5, %v164_v47 }
 0x1a1   :  { %v177_v51 = vmul.f32 %v232_v45, %v172_v48 }
 0x1a2   :  { %v166_v52 = vsub.f32 1.5, %v165_v50 }
 0x1a3   :  { %v182_v53 = vadd.f32 %v233_v49, %v177_v51 }
 0x1a4   :  { %v167_v54 = vmul.f32 %v239_v42, %v166_v52 }
 0x1a5   :  { %184 = vst.msk [vmem:[#allocation8] sm:$0xff] %vm103_vm0, %v182_v53 }
 0x1a6   :  { %v171_v55 = vsel %vm170_vm7, %v239_v42, %v167_v54 }
 0x1a7   :  { %v173_v56 = vmul.f32 %v171_v55, %v139_v28 }
 0x1a9   :  { %v178_v57 = vmul.f32 %v232_v45, %v173_v56 }
 0x1ab   :  { %v183_v58 = vadd.f32 %v233_v49, %v178_v57 }
 0x1ad   :  { %185 = vst.msk [vmem:[#allocation8 + $0x8] sm:$0xff] %vm103_vm0, %v183_v58 }
 0x1ae   :  { %198 = dma.vmem_to_hbm [thread:$0]  %s191_s18, 256, %s193_s21, [#allocation4], %s347_s13, %s347_s13, %s348_s14  }
 0x1af   :  { %340 = dma.done.wait [#allocation4], 256  }
 0x1b0   :  { %341 = vsyncadd [#allocation4], 4294967040 }
 0x1b1   :  { %203 = vsyncpa [#allocation3], 1 }
 0x1b2   :  { %204 = vsyncpa [#allocation6], 1 }
 0x1b3   :  { %205 = vsyncpa [#allocation4], 1 }

</bundles_post_ra>
